<compile_context>
chip_gen: v6e
topology: v6e:2x2x1
jax: 0.10.0
libtpu: 0.0.40
codegen_flags: <defaults>
</compile_context>

<pallas_src>
import functools

import jax
import jax.numpy as jnp
from jax.experimental import pallas as pl
from jax.experimental.pallas import tpu as pltpu


def _lgg_kernel(xs_ref, adj_ref, wb1_ref, wb2_ref, noise_ref,
                psel_ref, itile_ref, ecat_ref, dg_ref, out_ref,
                *, tau, B, N, D, H, K):
    BN = B * N
    NN = N * N
    inv_tau = 1.0 / tau

    xs = xs_ref[...]                 # (BN, D)    all batches stacked on rows
    adj = adj_ref[...]               # (BN, BN)   block-diagonal adjacency
    wb1 = wb1_ref[...]               # (D+1, 3H)  [W1cat ; b1cat]
    wb2 = wb2_ref[...]               # (3H+1, 3K) [W2blk ; b2cat]
    w1 = wb1[:D, :]
    b1 = wb1[D:D + 1, :]
    w2 = wb2[:3 * H, :]
    b2 = wb2[3 * H:3 * H + 1, :]

    # ---- fused 2-layer GCN for the three heads (mu | sig | pi) ----
    xw = jnp.dot(xs, w1, preferred_element_type=jnp.float32)            # (BN, 3H)
    h = jnp.maximum(
        jnp.dot(adj, xw, preferred_element_type=jnp.float32) + b1, 0.0)  # (BN, 3H)
    hw = jnp.dot(h, w2, preferred_element_type=jnp.float32)             # (BN, 3K)
    o = jnp.dot(adj, hw, preferred_element_type=jnp.float32) + b2       # (BN, 3K)

    mu = o[:, 0 * K:1 * K]
    sig = o[:, 1 * K:2 * K]
    pi = o[:, 2 * K:3 * K]

    noise = noise_ref[...]           # (BN, K+1)  [gumbel_pi (K) | normal (1)]
    g_pi = noise[:, :K]
    n = noise[:, K:K + 1]

    # ---- logits = log(softmax(pi)); soft gumbel-softmax over K ----
    pim = jnp.max(pi, axis=-1, keepdims=True)
    psh = pi - pim
    logits = psh - jnp.log(jnp.sum(jnp.exp(psh), axis=-1, keepdims=True))
    y = (logits + g_pi) * inv_tau
    y = y - jnp.max(y, axis=-1, keepdims=True)
    ey = jnp.exp(y)
    pi_oh = ey / jnp.sum(ey, axis=-1, keepdims=True)                    # (BN, K)

    mu_k = jnp.sum(mu * pi_oh, axis=-1, keepdims=True)                  # (BN, 1)
    sig_k = jnp.sum(sig * pi_oh, axis=-1, keepdims=True)                # (BN, 1)
    S = mu_k + n * sig_k                                                # (BN, 1)

    # ---- lane-dense outer product Sim[b, i*N+j] = S[b,i]*S[b,j] ----
    # Relayout S (BN,1) -> (B,N) and spread rows/cols to (B, N*N) with tiny
    # exact one-hot selector matmuls (no in-kernel reshape/transpose).
    s_bn = jnp.dot(psel_ref[...], S * itile_ref[...],
                   preferred_element_type=jnp.float32)                  # (B, N)
    se = jnp.dot(s_bn, ecat_ref[...],
                 preferred_element_type=jnp.float32)                    # (B, 2*NN)
    sim = se[:, :NN] * se[:, NN:]                                       # (B, NN)

    p = jax.nn.sigmoid(sim)
    # 2-class soft gumbel-softmax, class 0:
    #   softmax([(log(p+.01)+g0)/tau, (log(1-p+.01)+g1)/tau])[0]
    #   == sigmoid((log((p+.01)/(1-p+.01)) + (g0-g1)) / tau)
    dg = dg_ref[...]                                                    # (B, NN)
    a0 = jax.nn.sigmoid(
        (jnp.log((p + 0.01) / (1.0 - p + 0.01)) + dg) * inv_tau)

    # mean over batch -> (1, N*N), reshaped to (N, N) in the wrapper
    out_ref[...] = jnp.mean(a0, axis=0, keepdims=True)


def latent_graph_generator(x, adj, w1s, b1s, w2s, b2s, g_pi, n_noise, g0, g1,
                           *, tau):
    B, N, D = x.shape
    H = w1s.shape[-1]
    K = w2s.shape[-1]
    BN, NN = B * N, N * N
    f32 = jnp.float32

    # --- fuse the three GNN heads into one wide weight slab (bias as last row)
    w1cat = jnp.concatenate([w1s[0], w1s[1], w1s[2]], axis=1)          # (D, 3H)
    b1cat = jnp.concatenate([b1s[0], b1s[1], b1s[2]], axis=1)          # (1, 3H)
    w2blk = jnp.zeros((3 * H, 3 * K), f32)                             # block-diag
    for i in range(3):
        w2blk = w2blk.at[i * H:(i + 1) * H, i * K:(i + 1) * K].set(w2s[i])
    b2cat = jnp.concatenate([b2s[0], b2s[1], b2s[2]], axis=1)          # (1, 3K)
    wb1 = jnp.concatenate([w1cat, b1cat], axis=0)                      # (D+1, 3H)
    wb2 = jnp.concatenate([w2blk, b2cat], axis=0)                      # (3H+1, 3K)

    # --- fold the batch: stack all samples on the row axis ---
    xs = x.reshape(BN, D).astype(f32)
    adj_bd = jnp.kron(jnp.eye(B, dtype=f32), adj.astype(f32))          # (BN, BN)

    # --- pack noise; merge the two edge-gumbel streams ---
    noise_nk = jnp.concatenate(
        [g_pi.reshape(BN, K), n_noise.reshape(BN, 1)], axis=1)         # (BN, K+1)
    dg = (g0 - g1).reshape(B, NN)                                      # (B, NN)

    # --- constant selector matrices for the lane-dense outer product ---
    eye_n = jnp.eye(N, dtype=f32)
    psel = jnp.kron(jnp.eye(B, dtype=f32), jnp.ones((1, N), f32))      # (B, BN)
    itile = jnp.tile(eye_n, (B, 1))                                    # (BN, N)
    erow = jnp.kron(eye_n, jnp.ones((1, N), f32))                      # (N, NN)
    ecol = jnp.tile(eye_n, (1, N))                                     # (N, NN)
    ecat = jnp.concatenate([erow, ecol], axis=1)                       # (N, 2*NN)

    kernel = functools.partial(_lgg_kernel, tau=float(tau),
                               B=B, N=N, D=D, H=H, K=K)

    vmem = pltpu.MemorySpace.VMEM
    out_flat = pl.pallas_call(
        kernel,
        out_shape=jax.ShapeDtypeStruct((1, NN), f32),
        in_specs=[pl.BlockSpec(memory_space=vmem) for _ in range(9)],
        out_specs=pl.BlockSpec(memory_space=vmem),
    )(xs, adj_bd, wb1, wb2, noise_nk, psel, itile, ecat, dg)

    # TODO(synk): for very large N (>=~2048) the (B,N*N) blocks should be
    # row-tiled over a grid to stay inside v7x's 64 MiB VMEM; not needed at
    # these sizes.
    return out_flat.reshape(N, N)


def _reference(x, adj, w1s, b1s, w2s, b2s, g_pi, n_noise, g0, g1, *, tau):
    # Pure-JAX reference for sanity checking.
    def head(i):
        h = jnp.maximum(jnp.einsum('nm,bmd,dh->bnh', adj, x, w1s[i]) + b1s[i], 0.0)
        return jnp.einsum('nm,bmh,hk->bnk', adj, h, w2s[i]) + b2s[i]

    mu, sig, pi = head(0), head(1), head(2)
    logits = jax.nn.log_softmax(pi, axis=-1)
    pi_onehot = jax.nn.softmax((logits + g_pi) / tau, axis=-1)
    mu_k = jnp.sum(mu * pi_onehot, axis=-1)
    sig_k = jnp.sum(sig * pi_onehot, axis=-1)
    S = (mu_k + n_noise * sig_k)[..., None]
    Sim = jnp.einsum('bnc,bcm->bnm', S, jnp.swapaxes(S, 1, 2))
    P = jax.nn.sigmoid(Sim)
    pp = jnp.stack((P + 0.01, 1.0 - P + 0.01), axis=3)
    g = jnp.stack((g0, g1), axis=3)
    pp_onehot = jax.nn.softmax((jnp.log(pp) + g) / tau, axis=-1)
    return jnp.mean(pp_onehot[:, :, :, 0], axis=0)


if __name__ == "__main__":
    B, N, D, H, K = 2, 16, 8, 32, 8
    tau = 0.5

    key = jax.random.PRNGKey(0)
    ks = jax.random.split(key, 10)

    x = jax.random.normal(ks[0], (B, N, D), dtype=jnp.float32)
    adj = jax.random.uniform(ks[1], (N, N), dtype=jnp.float32)   # A_0 / adj_fix

    w1s = 0.1 * jax.random.normal(ks[2], (3, D, H), dtype=jnp.float32)
    b1s = 0.1 * jax.random.normal(ks[3], (3, 1, H), dtype=jnp.float32)
    w2s = 0.1 * jax.random.normal(ks[4], (3, H, K), dtype=jnp.float32)
    b2s = 0.1 * jax.random.normal(ks[5], (3, 1, K), dtype=jnp.float32)

    # deterministic noise: gumbel for both gumbel-softmaxes, normal for S
    g_pi = jax.random.gumbel(ks[6], (B, N, K), dtype=jnp.float32)
    n_noise = jax.random.normal(ks[7], (B, N), dtype=jnp.float32)
    g0 = jax.random.gumbel(ks[8], (B, N, N), dtype=jnp.float32)
    g1 = jax.random.gumbel(ks[9], (B, N, N), dtype=jnp.float32)

    A = latent_graph_generator(x, adj, w1s, b1s, w2s, b2s, g_pi, n_noise,
                               g0, g1, tau=tau)
    A = jax.block_until_ready(A)

    A_ref = _reference(x, adj, w1s, b1s, w2s, b2s, g_pi, n_noise, g0, g1,
                       tau=tau)
    assert A.shape == (N, N)
    assert jnp.allclose(A, A_ref, rtol=1e-3, atol=1e-3), "mismatch vs reference"

    # TODO(synk): dropout inside MultilayerGNN is inference-mode identity here;
    # graph pooling branch (args.gnn_pooling != 'NONE') not modeled.
    print("KERNEL_OK")
</pallas_src>

<mosaic_0001>
module attributes {stable_mosaic.version = 11 : i64} {
  func.func @_lgg_kernel(%arg0: memref<32x8xf32, #tpu.memory_space<vmem>>, %arg1: memref<32x32xf32, #tpu.memory_space<vmem>>, %arg2: memref<9x96xf32, #tpu.memory_space<vmem>>, %arg3: memref<97x24xf32, #tpu.memory_space<vmem>>, %arg4: memref<32x9xf32, #tpu.memory_space<vmem>>, %arg5: memref<2x32xf32, #tpu.memory_space<vmem>>, %arg6: memref<32x16xf32, #tpu.memory_space<vmem>>, %arg7: memref<16x512xf32, #tpu.memory_space<vmem>>, %arg8: memref<2x256xf32, #tpu.memory_space<vmem>>, %arg9: memref<1x256xf32, #tpu.memory_space<vmem>>) attributes {dimension_semantics = [], scalar_prefetch = 0 : i64, scratch_operands = 0 : i64, tpu.core_type = #tpu.core_type<tc>} {
    %c0 = arith.constant 0 : index
    %c0_0 = arith.constant 0 : index
    %0 = vector.load %arg0[%c0, %c0_0] : memref<32x8xf32, #tpu.memory_space<vmem>>, vector<32x8xf32>
    %c0_1 = arith.constant 0 : index
    %c0_2 = arith.constant 0 : index
    %1 = vector.load %arg1[%c0_1, %c0_2] : memref<32x32xf32, #tpu.memory_space<vmem>>, vector<32x32xf32>
    %c0_3 = arith.constant 0 : index
    %c0_4 = arith.constant 0 : index
    %2 = vector.load %arg2[%c0_3, %c0_4] : memref<9x96xf32, #tpu.memory_space<vmem>>, vector<9x96xf32>
    %c0_5 = arith.constant 0 : index
    %c0_6 = arith.constant 0 : index
    %3 = vector.load %arg3[%c0_5, %c0_6] : memref<97x24xf32, #tpu.memory_space<vmem>>, vector<97x24xf32>
    %4 = vector.extract_strided_slice %2 {offsets = [0, 0], sizes = [8, 96], strides = [1, 1]} : vector<9x96xf32> to vector<8x96xf32>
    %5 = vector.extract_strided_slice %2 {offsets = [8, 0], sizes = [1, 96], strides = [1, 1]} : vector<9x96xf32> to vector<1x96xf32>
    %6 = vector.extract_strided_slice %3 {offsets = [0, 0], sizes = [96, 24], strides = [1, 1]} : vector<97x24xf32> to vector<96x24xf32>
    %7 = vector.extract_strided_slice %3 {offsets = [96, 0], sizes = [1, 24], strides = [1, 1]} : vector<97x24xf32> to vector<1x24xf32>
    %cst = arith.constant dense<0.000000e+00> : vector<32x96xf32>
    %8 = tpu.matmul %0, %4, %cst {dimension_numbers = #tpu.dot_dimension_numbers<[1], [0], [0], [1], [0, 0, 1, 1], [], []>} : vector<32x8xf32>, vector<8x96xf32>, vector<32x96xf32> -> vector<32x96xf32>
    %cst_7 = arith.constant dense<0.000000e+00> : vector<32x96xf32>
    %9 = tpu.matmul %1, %8, %cst_7 {dimension_numbers = #tpu.dot_dimension_numbers<[1], [0], [0], [1], [0, 0, 1, 1], [], []>} : vector<32x32xf32>, vector<32x96xf32>, vector<32x96xf32> -> vector<32x96xf32>
    %10 = vector.broadcast %5 : vector<1x96xf32> to vector<32x96xf32>
    %11 = arith.addf %9, %10 : vector<32x96xf32>
    %cst_8 = arith.constant 0.000000e+00 : f32
    %12 = vector.broadcast %cst_8 : f32 to vector<32x96xf32>
    %13 = arith.maximumf %11, %12 : vector<32x96xf32>
    %cst_9 = arith.constant dense<0.000000e+00> : vector<32x24xf32>
    %14 = tpu.matmul %13, %6, %cst_9 {dimension_numbers = #tpu.dot_dimension_numbers<[1], [0], [0], [1], [0, 0, 1, 1], [], []>} : vector<32x96xf32>, vector<96x24xf32>, vector<32x24xf32> -> vector<32x24xf32>
    %cst_10 = arith.constant dense<0.000000e+00> : vector<32x24xf32>
    %15 = tpu.matmul %1, %14, %cst_10 {dimension_numbers = #tpu.dot_dimension_numbers<[1], [0], [0], [1], [0, 0, 1, 1], [], []>} : vector<32x32xf32>, vector<32x24xf32>, vector<32x24xf32> -> vector<32x24xf32>
    %16 = vector.broadcast %7 : vector<1x24xf32> to vector<32x24xf32>
    %17 = arith.addf %15, %16 : vector<32x24xf32>
    %18 = vector.extract_strided_slice %17 {offsets = [0, 0], sizes = [32, 8], strides = [1, 1]} : vector<32x24xf32> to vector<32x8xf32>
    %19 = vector.extract_strided_slice %17 {offsets = [0, 8], sizes = [32, 8], strides = [1, 1]} : vector<32x24xf32> to vector<32x8xf32>
    %20 = vector.extract_strided_slice %17 {offsets = [0, 16], sizes = [32, 8], strides = [1, 1]} : vector<32x24xf32> to vector<32x8xf32>
    %c0_11 = arith.constant 0 : index
    %c0_12 = arith.constant 0 : index
    %21 = vector.load %arg4[%c0_11, %c0_12] : memref<32x9xf32, #tpu.memory_space<vmem>>, vector<32x9xf32>
    %22 = vector.extract_strided_slice %21 {offsets = [0, 0], sizes = [32, 8], strides = [1, 1]} : vector<32x9xf32> to vector<32x8xf32>
    %23 = vector.extract_strided_slice %21 {offsets = [0, 8], sizes = [32, 1], strides = [1, 1]} : vector<32x9xf32> to vector<32x1xf32>
    %cst_13 = arith.constant dense<0xFF800000> : vector<32xf32>
    %24 = vector.multi_reduction <maximumf>, %20, %cst_13 [1] : vector<32x8xf32> to vector<32xf32>
    %25 = vector.shape_cast %24 : vector<32xf32> to vector<32x1xf32>
    %26 = vector.broadcast %25 : vector<32x1xf32> to vector<32x8xf32>
    %27 = arith.subf %20, %26 : vector<32x8xf32>
    %28 = math.exp %27 : vector<32x8xf32>
    %cst_14 = arith.constant dense<0.000000e+00> : vector<32xf32>
    %29 = vector.multi_reduction <add>, %28, %cst_14 [1] : vector<32x8xf32> to vector<32xf32>
    %30 = vector.shape_cast %29 : vector<32xf32> to vector<32x1xf32>
    %31 = math.log %30 : vector<32x1xf32>
    %32 = vector.broadcast %31 : vector<32x1xf32> to vector<32x8xf32>
    %33 = arith.subf %27, %32 : vector<32x8xf32>
    %34 = arith.addf %33, %22 : vector<32x8xf32>
    %cst_15 = arith.constant 2.000000e+00 : f32
    %35 = vector.broadcast %cst_15 : f32 to vector<32x8xf32>
    %36 = arith.mulf %34, %35 : vector<32x8xf32>
    %cst_16 = arith.constant dense<0xFF800000> : vector<32xf32>
    %37 = vector.multi_reduction <maximumf>, %36, %cst_16 [1] : vector<32x8xf32> to vector<32xf32>
    %38 = vector.shape_cast %37 : vector<32xf32> to vector<32x1xf32>
    %39 = vector.broadcast %38 : vector<32x1xf32> to vector<32x8xf32>
    %40 = arith.subf %36, %39 : vector<32x8xf32>
    %41 = math.exp %40 : vector<32x8xf32>
    %cst_17 = arith.constant dense<0.000000e+00> : vector<32xf32>
    %42 = vector.multi_reduction <add>, %41, %cst_17 [1] : vector<32x8xf32> to vector<32xf32>
    %43 = vector.shape_cast %42 : vector<32xf32> to vector<32x1xf32>
    %44 = vector.broadcast %43 : vector<32x1xf32> to vector<32x8xf32>
    %45 = arith.divf %41, %44 : vector<32x8xf32>
    %46 = arith.mulf %18, %45 : vector<32x8xf32>
    %cst_18 = arith.constant dense<0.000000e+00> : vector<32xf32>
    %47 = vector.multi_reduction <add>, %46, %cst_18 [1] : vector<32x8xf32> to vector<32xf32>
    %48 = vector.shape_cast %47 : vector<32xf32> to vector<32x1xf32>
    %49 = arith.mulf %19, %45 : vector<32x8xf32>
    %cst_19 = arith.constant dense<0.000000e+00> : vector<32xf32>
    %50 = vector.multi_reduction <add>, %49, %cst_19 [1] : vector<32x8xf32> to vector<32xf32>
    %51 = vector.shape_cast %50 : vector<32xf32> to vector<32x1xf32>
    %52 = arith.mulf %23, %51 : vector<32x1xf32>
    %53 = arith.addf %48, %52 : vector<32x1xf32>
    %c0_20 = arith.constant 0 : index
    %c0_21 = arith.constant 0 : index
    %54 = vector.load %arg5[%c0_20, %c0_21] : memref<2x32xf32, #tpu.memory_space<vmem>>, vector<2x32xf32>
    %c0_22 = arith.constant 0 : index
    %c0_23 = arith.constant 0 : index
    %55 = vector.load %arg6[%c0_22, %c0_23] : memref<32x16xf32, #tpu.memory_space<vmem>>, vector<32x16xf32>
    %56 = vector.broadcast %53 : vector<32x1xf32> to vector<32x16xf32>
    %57 = arith.mulf %56, %55 : vector<32x16xf32>
    %cst_24 = arith.constant dense<0.000000e+00> : vector<2x16xf32>
    %58 = tpu.matmul %54, %57, %cst_24 {dimension_numbers = #tpu.dot_dimension_numbers<[1], [0], [0], [1], [0, 0, 1, 1], [], []>} : vector<2x32xf32>, vector<32x16xf32>, vector<2x16xf32> -> vector<2x16xf32>
    %c0_25 = arith.constant 0 : index
    %c0_26 = arith.constant 0 : index
    %59 = vector.load %arg7[%c0_25, %c0_26] : memref<16x512xf32, #tpu.memory_space<vmem>>, vector<16x512xf32>
    %cst_27 = arith.constant dense<0.000000e+00> : vector<2x512xf32>
    %60 = tpu.matmul %58, %59, %cst_27 {dimension_numbers = #tpu.dot_dimension_numbers<[1], [0], [0], [1], [0, 0, 1, 1], [], []>} : vector<2x16xf32>, vector<16x512xf32>, vector<2x512xf32> -> vector<2x512xf32>
    %61 = vector.extract_strided_slice %60 {offsets = [0, 0], sizes = [2, 256], strides = [1, 1]} : vector<2x512xf32> to vector<2x256xf32>
    %62 = vector.extract_strided_slice %60 {offsets = [0, 256], sizes = [2, 256], strides = [1, 1]} : vector<2x512xf32> to vector<2x256xf32>
    %63 = arith.mulf %61, %62 : vector<2x256xf32>
    %64 = arith.negf %63 : vector<2x256xf32>
    %65 = math.exp %64 : vector<2x256xf32>
    %cst_28 = arith.constant 1.000000e+00 : f32
    %66 = vector.broadcast %cst_28 : f32 to vector<2x256xf32>
    %67 = arith.addf %66, %65 : vector<2x256xf32>
    %68 = arith.divf %66, %67 : vector<2x256xf32>
    %c0_29 = arith.constant 0 : index
    %c0_30 = arith.constant 0 : index
    %69 = vector.load %arg8[%c0_29, %c0_30] : memref<2x256xf32, #tpu.memory_space<vmem>>, vector<2x256xf32>
    %cst_31 = arith.constant 0.00999999977 : f32
    %70 = vector.broadcast %cst_31 : f32 to vector<2x256xf32>
    %71 = arith.addf %68, %70 : vector<2x256xf32>
    %cst_32 = arith.constant 1.000000e+00 : f32
    %72 = vector.broadcast %cst_32 : f32 to vector<2x256xf32>
    %73 = arith.subf %72, %68 : vector<2x256xf32>
    %cst_33 = arith.constant 0.00999999977 : f32
    %74 = vector.broadcast %cst_33 : f32 to vector<2x256xf32>
    %75 = arith.addf %73, %74 : vector<2x256xf32>
    %76 = arith.divf %71, %75 : vector<2x256xf32>
    %77 = math.log %76 : vector<2x256xf32>
    %78 = arith.addf %77, %69 : vector<2x256xf32>
    %cst_34 = arith.constant 2.000000e+00 : f32
    %79 = vector.broadcast %cst_34 : f32 to vector<2x256xf32>
    %80 = arith.mulf %78, %79 : vector<2x256xf32>
    %81 = arith.negf %80 : vector<2x256xf32>
    %82 = math.exp %81 : vector<2x256xf32>
    %cst_35 = arith.constant 1.000000e+00 : f32
    %83 = vector.broadcast %cst_35 : f32 to vector<2x256xf32>
    %84 = arith.addf %83, %82 : vector<2x256xf32>
    %85 = arith.divf %83, %84 : vector<2x256xf32>
    %cst_36 = arith.constant dense<0.000000e+00> : vector<256xf32>
    %86 = vector.multi_reduction <add>, %85, %cst_36 [0] : vector<2x256xf32> to vector<256xf32>
    %87 = vector.shape_cast %86 : vector<256xf32> to vector<1x256xf32>
    %cst_37 = arith.constant 2.000000e+00 : f32
    %88 = vector.broadcast %cst_37 : f32 to vector<1x256xf32>
    %89 = arith.divf %87, %88 : vector<1x256xf32>
    %c0_38 = arith.constant 0 : index
    %c0_39 = arith.constant 0 : index
    %90 = vector.load %arg9[%c0_38, %c0_39] : memref<1x256xf32, #tpu.memory_space<vmem>>, vector<1x256xf32>
    tpu.vector_store %arg9[%c0_38, %c0_39], %89 {strides = array<i32>} : memref<1x256xf32, #tpu.memory_space<vmem>>, vector<1x256xf32>,
    return
  }
}

</mosaic_0001>

<bundles_post_ra>
// kernel: tpu_custom_call.1
= control target key start
LH: loop header
LB: loop body
LE: loop exit
PB: predicated region body
PF: predicated region fallthrough
CT: control target
= control target key end

     0   :  { %vm56_vm0 = vcmask 64512   ;;  %s1577_s0 = inlined_call_operand.vmem [shape: f32[32,8], index: 0, kind: input, shape index: {}]   ;;  %s1578_s1 = inlined_call_operand.vmem [shape: f32[32,32], index: 1, kind: input, shape index: {}]   ;;  %s1579_s2 = inlined_call_operand.vmem [shape: f32[9,96], index: 2, kind: input, shape index: {}]   ;;  %s1580_s3 = inlined_call_operand.vmem [shape: f32[97,24], index: 3, kind: input, shape index: {}]   ;;  %s1581_s4 = inlined_call_operand.vmem [shape: f32[32,9], index: 4, kind: input, shape index: {}]   ;;  %s1582_s5 = inlined_call_operand.vmem [shape: f32[2,32], index: 5, kind: input, shape index: {}]   ;;  %s1583_s6 = inlined_call_operand.vmem [shape: f32[32,16], index: 6, kind: input, shape index: {}]   ;;  %s1584_s7 = inlined_call_operand.vmem [shape: f32[16,512], index: 7, kind: input, shape index: {}]   ;;  %s1585_s8 = inlined_call_operand.vmem [shape: f32[2,256], index: 8, kind: input, shape index: {}]   ;;  %s1586_s9 = inlined_call_operand.hbm [shape: f32[1,256], index: 9, kind: output, shape index: {}]  }
   0x1   :  { %v41_v0 = vld [vmem:[%s1579_s2] sm:$0xff]  ;;  %v34_v2 = vld [vmem:[%s1577_s0 + $0x8] sm:$0xff]  ;;  %v35_v3 = vld [vmem:[%s1577_s0 + $0x10] sm:$0xff] }
   0x2   :  { %v33_v1 = vld [vmem:[%s1577_s0] sm:$0xff]  ;;  %1119 = vmatprep.subr.mxu0 %v41_v0 }
   0x3   :  { %1121 = vmatprep.mubr.msk.f32.mxu0 %vm56_vm0, %v33_v1 }
   0x4   :  { %14 = vsyncpa [#allocation3], 0  ;;  %1120 = vmatpush3.msra.mxu0 %v41_v0  ;;  %v36_v4 = vld [vmem:[%s1577_s0 + $0x18] sm:$0xff]  ;;  %v37_v5 = vld [vmem:[%s1578_s1] sm:$0xff]  ;;  %vm158_vm1 = vcmask 261120   ;;  %vm260_vm2 = vcmask 785408  }
   0x5   :  { %1122 = vmatmul.mubr.msk.f32.vlgmr.msra.gmra.mxu0 %vm56_vm0, %v34_v2  ;;  %1135 = vmatprep.mubr.msk.f32.mxu1 %vm158_vm1, %v37_v5  ;;  %v54_v6 = vld [vmem:[%s1580_s3 + $0x58] sm:$0xff]  ;;  %v53_v7 = vld [vmem:[%s1580_s3 + $0x50] sm:$0xff]  ;;  %v52_v8 = vld [vmem:[%s1580_s3 + $0x48] sm:$0xff]  ;;  %vm451_vm3 = vcmask 195712   ;;  %s1285_s11 = smov 16   ;;  %vm1289_vm4 = vmmov 0  }
   0x6   :  { %1124 = vmatprep.mubr.msk.f32.mxu0 %vm56_vm0, %v35_v3  ;;  %1141 = vmatprep.subr.mxu0 %v54_v6  ;;  %v51_v9 = vld [vmem:[%s1580_s3 + $0x40] sm:$0xff]  ;;  %v50_v10 = vld [vmem:[%s1580_s3 + $0x38] sm:$0xff]  ;;  %v49_v11 = vld [vmem:[%s1580_s3 + $0x30] sm:$0xff]  ;;  %vm794_vm5 = vcmask 130048   ;;  %vm996_vm6 = vcmask 1041408  }
   0x7   :  { %1142 = vmatpush3.msra.mxu0 %v54_v6  ;;  %v48_v12 = vld [vmem:[%s1580_s3 + $0x28] sm:$0xff]  ;;  %v47_v13 = vld [vmem:[%s1580_s3 + $0x20] sm:$0xff]  ;;  %v39_v19 = vld [vmem:[%s1578_s1 + $0x10] sm:$0xff] }
   0x8   :  { %1143 = vmatprep.subr.mxu0 %v53_v7  ;;  %v38_v18 = vld [vmem:[%s1578_s1 + $0x8] sm:$0xff]  ;;  %v40_v20 = vld [vmem:[%s1578_s1 + $0x18] sm:$0xff]  ;;  %v45_v22 = vld [vmem:[%s1580_s3 + $0x10] sm:$0xff] }
   0x9   :  { %1125 = vmatmul.mubr.msk.f32.gmra.mxu0 %vm56_vm0, %v36_v4  ;;  %v46_v21 = vld [vmem:[%s1580_s3 + $0x18] sm:$0xff]  ;;  %v44_v23 = vld [vmem:[%s1580_s3 + $0x8] sm:$0xff]  ;;  %v43_v24 = vld [vmem:[%s1580_s3] sm:$0xff] }
   0xa   :  { %1144 = vmatpush3.msra.mxu0 %v53_v7  ;;  %v1055_v25 = vld [vmem:[%s1579_s2 + $0x8] ss:$0 sm:$0xff]  ;;  %v1064_v42 = vld [vmem:[%s1580_s3 + $0x60] ss:$0 sm:$0xff]  ;;  %s1284_s3 = smov 112   ;;  %v1459_v7 = vld [vmem:[%s1581_s4 + $0x10] sm:$0xff] }
   0xb   :  { %1145 = vmatprep.subr.mxu0 %v52_v8 }
   0xc   :  { %1146 = vmatpush3.msra.mxu0 %v52_v8  ;;  %v1465_v8 = vld [vmem:[%s1581_s4 + $0x8] sm:$0xff] }
   0xd   :  { %1147 = vmatprep.subr.mxu0 %v51_v9 }
   0xe   :  { %1148 = vmatpush3.msra.mxu0 %v51_v9 }
   0xf   :  { %1149 = vmatprep.subr.mxu0 %v50_v10 }
  0x10   :  { %1150 = vmatpush3.msra.mxu0 %v50_v10 }
  0x11   :  { %1151 = vmatprep.subr.mxu0 %v49_v11 }
  0x12   :  { %1152 = vmatpush3.msra.mxu0 %v49_v11 }
  0x13   :  { %1153 = vmatprep.subr.mxu0 %v48_v12 }
  0x14   :  { %1154 = vmatpush3.msra.mxu0 %v48_v12 }
  0x15   :  { %1155 = vmatprep.subr.mxu0 %v47_v13 }
  0x16   :  { %1156 = vmatpush3.msra.mxu0 %v47_v13 }
  0x17   :  { %1157 = vmatprep.subr.mxu0 %v46_v21 }
  0x18   :  { %1158 = vmatpush3.msra.mxu0 %v46_v21 }
  0x19   :  { %1159 = vmatprep.subr.mxu0 %v45_v22 }
  0x1a   :  { %1160 = vmatpush3.msra.mxu0 %v45_v22 }
  0x1b   :  { %1161 = vmatprep.subr.mxu0 %v44_v23 }
  0x1c   :  { %1162 = vmatpush3.msra.mxu0 %v44_v23 }
  0x1d   :  { %1163 = vmatprep.subr.mxu0 %v43_v24 }
  0x1e   :  { %1164 = vmatpush3.msra.mxu0 %v43_v24 }
  0xc5   :  { %v1123_v14 = vpop.f32.mrf.mxu0 }
  0xc7   :  { %v135_v15 = vpop.f32.mrf.mxu0 }
  0xc9   :  { %v1126_v16 = vpop.f32.mrf.mxu0 }
  0xca   :  { %1127 = vmatprep.subr.mxu1 %v1126_v16 }
  0xcb   :  { %v145_v17 = vpop.f32.mrf.mxu0  ;;  %1128 = vmatpush3.msra.mxu1 %v1126_v16 }
  0xcc   :  { %1129 = vmatprep.subr.mxu1 %v145_v17 }
  0xcd   :  { %1130 = vmatpush3.msra.mxu1 %v145_v17  ;;  %v1475_v17 = vld [vmem:[%s1581_s4] sm:$0xff] }
  0xce   :  { %1131 = vmatprep.subr.mxu1 %v1123_v14 }
  0xcf   :  { %1132 = vmatpush3.msra.mxu1 %v1123_v14 }
  0xd0   :  { %1133 = vmatprep.subr.mxu1 %v135_v15 }
  0xd1   :  { %1134 = vmatpush3.msra.mxu1 %v135_v15 }
  0xd2   :  { %1136 = vmatmul.mubr.msk.f32.vlgmr.msra.gmra.mxu1 %vm158_vm1, %v38_v18 }
  0xd3   :  { %1138 = vmatprep.mubr.msk.f32.mxu1 %vm158_vm1, %v39_v19 }
  0xd6   :  { %1139 = vmatmul.mubr.msk.f32.gmra.mxu1 %vm158_vm1, %v40_v20 }
  0xd7   :  { %1179 = vmatprep.mubr.msk.f32.mxu1 %vm158_vm1, %v37_v5 }
 0x192   :  { %v1137_v26 = vpop.f32.mrf.mxu1 }
 0x193   :  { %v243_v27 = vadd.f32 %v1137_v26, %v1055_v25 }
 0x194   :  { %v237_v28 = vpop.f32.mrf.mxu1 }
 0x195   :  { %v238_v29 = vadd.f32 %v1055_v25, %v237_v28  ;;  %v257_v32 = vmax.f32 %v243_v27, 0.0 }
 0x196   :  { %v1140_v30 = vpop.f32.mrf.mxu1 }
 0x197   :  { %v256_v31 = vmax.f32 %v238_v29, 0.0  ;;  %v253_v33 = vadd.f32 %v1140_v30, %v1055_v25 }
 0x198   :  { %v247_v34 = vpop.f32.mrf.mxu1 }
 0x199   :  { %v248_v35 = vadd.f32 %v1055_v25, %v247_v34  ;;  %1165 = vmatprep.mubr.msk.f32.mxu0 %vm260_vm2, %v256_v31  ;;  %v259_v37 = vmax.f32 %v253_v33, 0.0 }
 0x19a   :  { %1166 = vmatmul.mubr.msk.f32.vlgmr.msra.gmra.mxu0 %vm260_vm2, %v257_v32 }
 0x19b   :  { %v258_v36 = vmax.f32 %v248_v35, 0.0 }
 0x19d   :  { %1168 = vmatprep.mubr.msk.f32.mxu0 %vm260_vm2, %v258_v36 }
 0x19e   :  { %1169 = vmatmul.mubr.msk.f32.gmra.mxu0 %vm260_vm2, %v259_v37 }
 0x25a   :  { %v1167_v38 = vpop.f32.mrf.mxu0 }
 0x25c   :  { %v339_v39 = vpop.f32.mrf.mxu0 }
 0x25e   :  { %v1170_v40 = vpop.f32.mrf.mxu0 }
 0x25f   :  { %1171 = vmatprep.subr.mxu1 %v1170_v40 }
 0x260   :  { %v349_v41 = vpop.f32.mrf.mxu0  ;;  %1172 = vmatpush3.msra.mxu1 %v1170_v40 }
 0x261   :  { %1173 = vmatprep.subr.mxu1 %v349_v41 }
 0x262   :  { %1174 = vmatpush3.msra.mxu1 %v349_v41 }
 0x263   :  { %1175 = vmatprep.subr.mxu1 %v1167_v38 }
 0x264   :  { %1176 = vmatpush3.msra.mxu1 %v1167_v38 }
 0x265   :  { %1177 = vmatprep.subr.mxu1 %v339_v39 }
 0x266   :  { %1178 = vmatpush3.msra.mxu1 %v339_v39 }
 0x267   :  { %1180 = vmatmul.mubr.msk.f32.vlgmr.msra.gmra.mxu1 %vm158_vm1, %v38_v18  ;;  %v1481_v18 = vld [vmem:[%s1581_s4 + $0x18] sm:$0xff]  ;;  %s1286_s4 = smov 120  }
 0x268   :  { %1182 = vmatprep.mubr.msk.f32.mxu1 %vm158_vm1, %v39_v19 }
 0x26b   :  { %1183 = vmatmul.mubr.msk.f32.gmra.mxu1 %vm158_vm1, %v40_v20 }
 0x327   :  { %v1181_v43 = vpop.f32.mrf.mxu1 }
 0x328   :  { %v1423_v44 = vadd.f32 %v1181_v43, %v1064_v42 }
 0x329   :  { %v428_v45 = vpop.f32.mrf.mxu1 }
 0x32a   :  { %v1425_v46 = vadd.f32 %v1064_v42, %v428_v45  ;;  %v455_v47 = vsel %vm451_vm3, %v1423_v44, -inf }
 0x32b   :  { %456 = vmax.xlane.f32.xlu1 %v455_v47  ;;  %v1184_v48 = vpop.f32.mrf.mxu1 }
 0x32c   :  { %v1429_v49 = vadd.f32 %v1184_v48, %v1064_v42  ;;  %v452_v53 = vsel %vm451_vm3, %v1425_v46, -inf }
 0x32d   :  { %v438_v50 = vpop.f32.mrf.mxu1 }
 0x32e   :  { %v1431_v51 = vadd.f32 %v1064_v42, %v438_v50  ;;  %v461_v52 = vsel %vm451_vm3, %v1429_v49, -inf }
 0x32f   :  { %462 = vmax.xlane.f32.xlu0 %v461_v52  ;;  %453 = vmax.xlane.f32.xlu1 %v452_v53 }
 0x330   :  { %v458_v54 = vsel %vm451_vm3, %v1431_v51, -inf }
 0x333   :  { %459 = vmax.xlane.f32.xlu0 %v458_v54 }
 0x3b4   :  { %v457_v55 = vpop.xlane.xlu1 %456 }
 0x3b5   :  { %v1440_v56 = vsub.f32 %v1423_v44, %v457_v55 }
 0x3b7   :  { %v470_v57 = vmul.f32 1.442695, %v1440_v56 }
 0x3b8   :  { %v463_v58 = vpop.xlane.xlu0 %462  ;;  %v454_v60 = vpop.xlane.xlu1 %453 }
 0x3b9   :  { %1206 = vpow2.f32 %v470_v57  ;;  %v1444_v59 = vsub.f32 %v1429_v49, %v463_v58  ;;  %v1448_v63 = vsub.f32 %v1425_v46, %v454_v60 }
 0x3bb   :  { %v474_v61 = vmul.f32 1.442695, %v1444_v59  ;;  %v468_v2 = vmul.f32 1.442695, %v1448_v63 }
 0x3bc   :  { %v460_v62 = vpop.xlane.xlu0 %459 }
 0x3bd   :  { %1208 = vpow2.f32 %v474_v61  ;;  %v466_v0 = vsub.f32 %v1431_v51, %v460_v62 }
 0x3bf   :  { %v472_v1 = vmul.f32 1.442695, %v466_v0 }
 0x3c1   :  { %1210 = vpow2.f32 %v472_v1 }
 0x3c2   :  { %1212 = vpow2.f32 %v468_v2 }
 0x3c6   :  { %v1207_v3 = vpop.eup %1206 }
 0x3c7   :  { %482 = vrot.lane.b32.xlu1 %v1207_v3, %s1284_s3 }
 0x3ca   :  { %v1209_v4 = vpop.eup %1208 }
 0x3cb   :  { %486 = vrot.lane.b32.xlu0 %v1209_v4, %s1284_s3 }
 0x3ce   :  { %v1211_v5 = vpop.eup %1210 }
 0x3cf   :  { %484 = vrot.lane.b32.xlu1 %v1211_v5, %s1284_s3  ;;  %v1213_v6 = vpop.eup %1212 }
 0x3d3   :  { %480 = vrot.lane.b32.xlu1 %v1213_v6, %s1284_s3 }
 0x3d7   :  { %524 = vrot.lane.b32.xlu1 %v1459_v7, %s1285_s11 }
 0x3db   :  { %522 = vrot.lane.b32.xlu1 %v1465_v8, %s1285_s11 }
 0x439   :  { %v483_v9 = vpop.permute.xlu1 %482 }
 0x43a   :  { %v495_v10 = vsel %vm56_vm0, %v483_v9, 0.0 }
 0x43b   :  { %496 = vadd.xlane.f32.xlu0 %v495_v10 }
 0x43d   :  { %v487_v15 = vpop.permute.xlu0 %486 }
 0x43e   :  { %v501_v16 = vsel %vm56_vm0, %v487_v15, 0.0 }
 0x441   :  { %v485_v11 = vpop.permute.xlu1 %484 }
 0x442   :  { %v498_v12 = vsel %vm56_vm0, %v485_v11, 0.0 }
 0x443   :  { %499 = vadd.xlane.f32.xlu1 %v498_v12 }
 0x445   :  { %v481_v13 = vpop.permute.xlu1 %480 }
 0x446   :  { %v492_v14 = vsel %vm56_vm0, %v481_v13, 0.0 }
 0x447   :  { %493 = vadd.xlane.f32.xlu0 %v492_v14 }
 0x449   :  { %v525_v19 = vpop.permute.xlu1 %524 }
 0x44b   :  { %502 = vadd.xlane.f32.xlu0 %v501_v16 }
 0x44d   :  { %v523_v20 = vpop.permute.xlu1 %522 }
 0x454   :  { %520 = vrot.lane.b32.xlu1 %v1475_v17, %s1285_s11 }
 0x461   :  { %526 = vrot.lane.b32.xlu0 %v1481_v18, %s1285_s11 }
 0x4c4   :  { %v497_v21 = vpop.xlane.xlu0 %496 }
 0x4cc   :  { %v500_v22 = vpop.xlane.xlu1 %499 }
 0x4cd   :  { %1214 = vlog2.f32 %v500_v22 }
 0x4ce   :  { %1216 = vlog2.f32 %v497_v21 }
 0x4d0   :  { %v494_v23 = vpop.xlane.xlu0 %493  ;;  %v521_v43 = vpop.permute.xlu1 %520 }
 0x4d1   :  { %1218 = vlog2.f32 %v494_v23 }
 0x4d4   :  { %v503_v24 = vpop.xlane.xlu0 %502 }
 0x4d5   :  { %1220 = vlog2.f32 %v503_v24 }
 0x4d8   :  { %v527_v38 = vpop.permute.xlu0 %526 }
 0x4da   :  { %v1215_v25 = vpop.eup %1214 }
 0x4db   :  { %v509_v26 = vmul.f32 0.6931472, %v1215_v25  ;;  %v1217_v27 = vpop.eup %1216 }
 0x4dc   :  { %v507_v29 = vmul.f32 0.6931472, %v1217_v27 }
 0x4dd   :  { %v514_v28 = vsub.f32 %v466_v0, %v509_v26 }
 0x4de   :  { %v1219_v31 = vpop.eup %1218  ;;  %v513_v37 = vsub.f32 %v1440_v56, %v507_v29 }
 0x4df   :  { %v534_v30 = vadd.f32 %v525_v19, %v514_v28  ;;  %v505_v34 = vmul.f32 0.6931472, %v1219_v31 }
 0x4e0   :  { %v533_v42 = vadd.f32 %v523_v20, %v513_v37 }
 0x4e1   :  { %v538_v32 = vmul.f32 2.0, %v534_v30  ;;  %v512_v40 = vsub.f32 %v1448_v63, %v505_v34 }
 0x4e2   :  { %v1221_v33 = vpop.eup %1220  ;;  %v537_v50 = vmul.f32 2.0, %v533_v42 }
 0x4e3   :  { %v511_v35 = vmul.f32 0.6931472, %v1221_v33  ;;  %v546_v36 = vsel %vm451_vm3, %v538_v32, -inf  ;;  %v532_v47 = vadd.f32 %v521_v43, %v512_v40 }
 0x4e4   :  { %547 = vmax.xlane.f32.xlu1 %v546_v36  ;;  %v543_v53 = vsel %vm451_vm3, %v537_v50, -inf }
 0x4e5   :  { %v515_v39 = vsub.f32 %v1444_v59, %v511_v35  ;;  %v536_v52 = vmul.f32 2.0, %v532_v47 }
 0x4e7   :  { %v535_v41 = vadd.f32 %v527_v38, %v515_v39  ;;  %v540_v54 = vsel %vm451_vm3, %v536_v52, -inf }
 0x4e9   :  { %v539_v45 = vmul.f32 2.0, %v535_v41 }
 0x4eb   :  { %v549_v48 = vsel %vm451_vm3, %v539_v45, -inf }
 0x4ec   :  { %550 = vmax.xlane.f32.xlu0 %v549_v48 }
 0x4f0   :  { %544 = vmax.xlane.f32.xlu0 %v543_v53 }
 0x4f4   :  { %541 = vmax.xlane.f32.xlu0 %v540_v54 }
 0x56d   :  { %v548_v57 = vpop.xlane.xlu1 %547 }
 0x56e   :  { %v554_v60 = vsub.f32 %v538_v32, %v548_v57 }
 0x570   :  { %v560_v0 = vmul.f32 1.442695, %v554_v60 }
 0x575   :  { %v551_v55 = vpop.xlane.xlu0 %550 }
 0x576   :  { %v555_v56 = vsub.f32 %v539_v45, %v551_v55 }
 0x578   :  { %v562_v58 = vmul.f32 1.442695, %v555_v56 }
 0x579   :  { %v545_v59 = vpop.xlane.xlu0 %544 }
 0x57a   :  { %1222 = vpow2.f32 %v562_v58  ;;  %v553_v61 = vsub.f32 %v537_v50, %v545_v59  ;;  %v1287_v59 = vmov 8  }
 0x57b   :  { %1205 = vset.pattern.permute.xlu1 %v1287_v59  ;;  %1204 = vset.pattern.permute.xlu0 %v1287_v59 }
 0x57c   :  { %v558_v62 = vmul.f32 1.442695, %v553_v61 }
 0x57d   :  { %v542_v63 = vpop.xlane.xlu0 %541 }
 0x57e   :  { %1224 = vpow2.f32 %v558_v62  ;;  %v552_v1 = vsub.f32 %v536_v52, %v542_v63 }
 0x57f   :  { %1226 = vpow2.f32 %v560_v0 }
 0x580   :  { %v556_v2 = vmul.f32 1.442695, %v552_v1 }
 0x582   :  { %1228 = vpow2.f32 %v556_v2 }
 0x587   :  { %v1223_v3 = vpop.eup %1222 }
 0x588   :  { %574 = vrot.lane.b32.xlu0 %v1223_v3, %s1284_s3 }
 0x58b   :  { %v1225_v4 = vpop.eup %1224 }
 0x58c   :  { %570 = vrot.lane.b32.xlu1 %v1225_v4, %s1284_s3  ;;  %v1227_v5 = vpop.eup %1226 }
 0x58f   :  { %v1229_v6 = vpop.eup %1228 }
 0x590   :  { %572 = vrot.lane.b32.xlu1 %v1227_v5, %s1284_s3 }
 0x594   :  { %568 = vrot.lane.b32.xlu1 %v1229_v6, %s1284_s3 }
 0x5fa   :  { %v575_v9 = vpop.permute.xlu0 %574 }
 0x5fb   :  { %v589_v10 = vsel %vm56_vm0, %v575_v9, 0.0 }
 0x5fc   :  { %590 = vadd.xlane.f32.xlu0 %v589_v10 }
 0x5fe   :  { %v571_v11 = vpop.permute.xlu1 %570 }
 0x5ff   :  { %v583_v12 = vsel %vm56_vm0, %v571_v11, 0.0 }
 0x600   :  { %584 = vadd.xlane.f32.xlu0 %v583_v12 }
 0x602   :  { %v573_v13 = vpop.permute.xlu1 %572 }
 0x603   :  { %v586_v14 = vsel %vm56_vm0, %v573_v13, 0.0 }
 0x604   :  { %587 = vadd.xlane.f32.xlu1 %v586_v14 }
 0x606   :  { %v569_v15 = vpop.permute.xlu1 %568 }
 0x607   :  { %v580_v16 = vsel %vm56_vm0, %v569_v15, 0.0 }
 0x608   :  { %581 = vadd.xlane.f32.xlu0 %v580_v16 }
 0x685   :  { %v591_v19 = vpop.xlane.xlu0 %590 }
 0x686   :  { %1230 = vrcp.f32 %v591_v19 }
 0x689   :  { %v585_v20 = vpop.xlane.xlu0 %584 }
 0x68a   :  { %1232 = vrcp.f32 %v585_v20 }
 0x68d   :  { %v588_v21 = vpop.xlane.xlu1 %587 }
 0x68e   :  { %1234 = vrcp.f32 %v588_v21  ;;  %v685_v21 = vld [vmem:[%s1583_s6] sm:$0xff] }
 0x691   :  { %v582_v22 = vpop.xlane.xlu0 %581 }
 0x692   :  { %1236 = vrcp.f32 %v582_v22 }
 0x693   :  { %v1231_v23 = vpop.eup %1230 }
 0x694   :  { %v599_v24 = vmul.f32 %v1231_v23, %v1223_v3 }
 0x696   :  { %638 = vrot.lane.b32.xlu0 %v599_v24, %s1286_s4 }
 0x697   :  { %v1233_v25 = vpop.eup %1232 }
 0x698   :  { %v595_v26 = vmul.f32 %v1233_v25, %v1225_v4  ;;  %v1288_v4 = vmov 0.0   ;;  %v684_v25 = vld [vmem:[%s1582_s5] sm:$0x3] }
 0x699   :  { %1185 = vmatprep.subr.mxu1 %v1288_v4  ;;  %1193 = vmatprep.mubr.msk.f32.mxu1 %vm1289_vm4, %v1288_v4 }
 0x69a   :  { %634 = vrot.lane.b32.xlu1 %v595_v26, %s1286_s4  ;;  %610 = vrot.lane.b32.xlu0 %v599_v24, %s1284_s3 }
 0x69b   :  { %v1235_v27 = vpop.eup %1234 }
 0x69c   :  { %v597_v28 = vmul.f32 %v1235_v27, %v1227_v5  ;;  %v790_v27 = vld [vmem:[%s1584_s7 + $0x20] sm:$0xff] }
 0x69e   :  { %606 = vrot.lane.b32.xlu0 %v595_v26, %s1284_s3  ;;  %636 = vrot.lane.b32.xlu1 %v597_v28, %s1286_s4  ;;  %v791_v26 = vld [vmem:[%s1584_s7 + $0x28] sm:$0xff] }
 0x69f   :  { %v1237_v29 = vpop.eup %1236 }
 0x6a0   :  { %v593_v30 = vmul.f32 %v1237_v29, %v1229_v6  ;;  %v786_v29 = vld [vmem:[%s1584_s7] sm:$0xff] }
 0x6a2   :  { %608 = vrot.lane.b32.xlu0 %v597_v28, %s1284_s3  ;;  %632 = vrot.lane.b32.xlu1 %v593_v30, %s1286_s4  ;;  %v787_v28 = vld [vmem:[%s1584_s7 + $0x8] sm:$0xff] }
 0x6a6   :  { %604 = vrot.lane.b32.xlu0 %v593_v30, %s1284_s3  ;;  %v793_v30 = vld [vmem:[%s1584_s7 + $0x38] sm:$0xff] }
 0x708   :  { %v639_v31 = vpop.permute.xlu0 %638 }
 0x709   :  { %v647_v37 = vmul.f32 %v639_v31, %v1429_v49  ;;  %v792_v31 = vld [vmem:[%s1584_s7 + $0x30] sm:$0xff] }
 0x70c   :  { %v611_v32 = vpop.permute.xlu0 %610  ;;  %v635_v33 = vpop.permute.xlu1 %634 }
 0x70d   :  { %v645_v34 = vmul.f32 %v635_v33, %v1423_v44  ;;  %v619_v45 = vmul.f32 %v611_v32, %v1429_v49  ;;  %v789_v33 = vld [vmem:[%s1584_s7 + $0x18] sm:$0xff] }
 0x70f   :  { %654 = vrot.lane.b32.xlu1 %v645_v34, %s1286_s4  ;;  %v629_v48 = vsel %vm56_vm0, %v619_v45, 0.0  ;;  %v788_v34 = vld [vmem:[%s1584_s7 + $0x10] sm:$0xff] }
 0x710   :  { %v607_v35 = vpop.permute.xlu0 %606  ;;  %v637_v36 = vpop.permute.xlu1 %636 }
 0x711   :  { %v646_v39 = vmul.f32 %v637_v36, %v1431_v51  ;;  %v617_v47 = vmul.f32 %v607_v35, %v1423_v44 }
 0x713   :  { %658 = vrot.lane.b32.xlu1 %v647_v37, %s1286_s4  ;;  %v623_v52 = vsel %vm56_vm0, %v617_v47, 0.0 }
 0x714   :  { %v609_v38 = vpop.permute.xlu0 %608  ;;  %v633_v41 = vpop.permute.xlu1 %632 }
 0x715   :  { %v618_v40 = vmul.f32 %v609_v38, %v1431_v51  ;;  %v644_v43 = vmul.f32 %v633_v41, %v1425_v46 }
 0x717   :  { %656 = vrot.lane.b32.xlu1 %v646_v39, %s1286_s4  ;;  %v626_v42 = vsel %vm56_vm0, %v618_v40, 0.0 }
 0x718   :  { %627 = vadd.xlane.f32.xlu0 %v626_v42  ;;  %v605_v50 = vpop.permute.xlu0 %604 }
 0x719   :  { %v616_v51 = vmul.f32 %v605_v50, %v1425_v46 }
 0x71b   :  { %652 = vrot.lane.b32.xlu1 %v644_v43, %s1286_s4  ;;  %v620_v53 = vsel %vm56_vm0, %v616_v51, 0.0 }
 0x73f   :  { %630 = vadd.xlane.f32.xlu1 %v629_v48 }
 0x743   :  { %624 = vadd.xlane.f32.xlu1 %v623_v52 }
 0x747   :  { %621 = vadd.xlane.f32.xlu1 %v620_v53 }
 0x781   :  { %v655_v54 = vpop.permute.xlu1 %654 }
 0x782   :  { %v667_v55 = vsel %vm56_vm0, %v655_v54, 0.0 }
 0x783   :  { %668 = vadd.xlane.f32.xlu0 %v667_v55 }
 0x785   :  { %v659_v56 = vpop.permute.xlu1 %658 }
 0x786   :  { %v673_v49 = vsel %vm56_vm0, %v659_v56, 0.0 }
 0x787   :  { %674 = vadd.xlane.f32.xlu0 %v673_v49 }
 0x789   :  { %v657_v44 = vpop.permute.xlu1 %656 }
 0x78a   :  { %v670_v57 = vsel %vm56_vm0, %v657_v44, 0.0 }
 0x78b   :  { %671 = vadd.xlane.f32.xlu0 %v670_v57 }
 0x78d   :  { %v653_v58 = vpop.permute.xlu1 %652 }
 0x78e   :  { %v664_v46 = vsel %vm56_vm0, %v653_v58, 0.0 }
 0x78f   :  { %665 = vadd.xlane.f32.xlu0 %v664_v46 }
 0x7a1   :  { %v628_v60 = vpop.xlane.xlu0 %627 }
 0x7c8   :  { %v631_v61 = vpop.xlane.xlu1 %630 }
 0x7cc   :  { %v625_v0 = vpop.xlane.xlu1 %624 }
 0x7d0   :  { %v622_v13 = vpop.xlane.xlu1 %621 }
 0x80c   :  { %v669_v62 = vpop.xlane.xlu0 %668 }
 0x80d   :  { %v677_v63 = vmul.f32 %v669_v62, %v1465_v8 }
 0x80f   :  { %v681_v1 = vadd.f32 %v677_v63, %v625_v0 }
 0x810   :  { %v675_v2 = vpop.xlane.xlu0 %674 }
 0x811   :  { %v679_v3 = vmul.f32 %v675_v2, %v1481_v18  ;;  %696 = vperm.xlu1 %1205, %v681_v1   ;;  %v688_v18 = vld [vmem:[%s1583_s6 + $0x18] sm:$0xff] }
 0x813   :  { %v683_v5 = vadd.f32 %v679_v3, %v631_v61 }
 0x814   :  { %v672_v6 = vpop.xlane.xlu0 %671 }
 0x815   :  { %v678_v9 = vmul.f32 %v672_v6, %v1459_v7  ;;  %706 = vperm.xlu0 %1204, %v683_v5   ;;  %v687_v7 = vld [vmem:[%s1583_s6 + $0x10] sm:$0xff] }
 0x817   :  { %v682_v10 = vadd.f32 %v678_v9, %v628_v60  ;;  %v1074_v60 = vld.sshfl [vmem:[%s1585_s8] sm:$0x33 pattern:$0x76325410]  ;;  %s1291_s8 = smov [#allocation2]  }
 0x818   :  { %v666_v11 = vpop.xlane.xlu0 %665  ;;  %v977_v63 = vcombine.high %v1074_v60, %v1074_v60  ;;  %s1043_s4 = sshll.u32 %s1291_s8, 4  ;;  %s1044_s4 = int_to_ptr.vmem [resolvable:$true] %s1043_s4 }
 0x819   :  { %v676_v12 = vmul.f32 %v666_v11, %v1475_v17  ;;  %701 = vperm.xlu1 %1205, %v682_v10   ;;  %v686_v17 = vld [vmem:[%s1583_s6 + $0x8] sm:$0xff]  ;;  %s1262_s18 = scalar_lea.vmem %s1044_s4, 32  ;;  %p1267_p1 = scmp.lt.s32.totalorder %s1044_s4, %s1044_s4 }
 0x81a   :  { %p1263_p0 = scmp.ne.s32.totalorder %s1044_s4, %s1262_s18  ;;  %p1268_p2 = scmp.lt.s32.totalorder %s1262_s18, %s1262_s18 }
 0x81b   :  { %v680_v8 = vadd.f32 %v676_v12, %v622_v13 }
 0x81c   :  { %p1269_p3 = por %p1268_p2, %p1267_p1 }
 0x81d   :  { %691 = vperm.xlu1 %1205, %v680_v8  }
 0x81e   :  { %p1270_p4 = pnand %p1269_p3, %p1263_p0 }
 0x88c   :  { %v697_v14 = vpop.permute.xlu1 %696 }
 0x88d   :  { %v710_v22 = vmul.f32 %v697_v14, %v686_v17 }
 0x890   :  { %v707_v15 = vpop.permute.xlu0 %706 }
 0x891   :  { %v712_v16 = vmul.f32 %v707_v15, %v688_v18 }
 0x893   :  { %1186 = vmatpush3.msra.mxu1 %v712_v16 }
 0x894   :  { %v702_v19 = vpop.permute.xlu1 %701  ;;  %1187 = vmatprep.subr.mxu1 %v1288_v4 }
 0x895   :  { %v711_v20 = vmul.f32 %v702_v19, %v687_v7 }
 0x897   :  { %1188 = vmatpush3.msra.mxu1 %v711_v20 }
 0x898   :  { %1189 = vmatprep.subr.mxu1 %v1288_v4  ;;  %v692_v23 = vpop.permute.xlu1 %691 }
 0x899   :  { %v709_v24 = vmul.f32 %v692_v23, %v685_v21  ;;  %1190 = vmatpush3.msra.mxu1 %v710_v22  ;;  %v1290_v23 = vmov 1966171168  }
 0x89a   :  { %1191 = vmatprep.subr.mxu1 %v1288_v4 }
 0x89b   :  { %1192 = vmatpush3.msra.mxu1 %v709_v24  ;;  %v1018_v24 = vunpack.c.l.s4 %v1290_v23 }
 0x89c   :  { %1194 = vmatmul.mubr.msk.f32.vlgmr.msra.gmra.mxu1 %vm158_vm1, %v684_v25  ;;  %826 = vmatprep.subr.mxu1 %v791_v26  ;;  %v1020_v25 = vlaneseq }
 0x89d   :  { %827 = vmatpush1.msra.mxu1 %v790_v27  ;;  %862 = vmatprep.mubr.f32.mxu1 %v1288_v4 }
 0x89e   :  { %828 = vmatprep.subr.mxu1 %v787_v28  ;;  %vm1034_vm7 = vcmp.lt.s32.totalorder %v1020_v25, 256 }
 0x89f   :  { %829 = vmatpush1.msra.mxu1 %v786_v29 }
 0x8a0   :  { %897 = vmatprep.subr.mxu1 %v793_v30  ;;  %v1019_v30 = vunpack.c.0.s8 %v1018_v24 }
 0x95c   :  { %v782_v32 = vpop.f32.mrf.mxu1 }
 0x95d   :  { %1070 = vmatmul.mubr.msk.f32.vlgmr.msra.gmra.mxu1 %vm794_vm5, %v782_v32 }
 0x95e   :  { %v1195_v35 = vpop.f32.mrf.mxu1  ;;  %898 = vmatpush1.msra.mxu1 %v792_v31  ;;  %933 = vmatprep.mubr.f32.mxu1 %v1288_v4  ;;  %v1021_v31 = vshrl.u32 %v1020_v25, 7 }
 0x95f   :  { %899 = vmatprep.subr.mxu1 %v789_v33 }
 0x960   :  { %900 = vmatpush1.msra.mxu1 %v788_v34  ;;  %v1022_v35 = vsub.s32 %v1019_v30, %v1021_v31 }
 0x961   :  { %1071 = vmatmul.mubr.msk.f32.vlgmr.msra.gmra.mxu1 %vm794_vm5, %v782_v32 }
 0xa1d   :  { %v864_v36 = vpop.f32.mrf.mxu1 }
 0xa1f   :  { %v866_v37 = vpop.f32.mrf.mxu1 }
 0xa21   :  { %v935_v38 = vpop.f32.mrf.mxu1 }
 0xa22   :  { %v940_v39 = vmul.f32 %v935_v38, %v864_v36 }
 0xa23   :  { %v937_v40 = vpop.f32.mrf.mxu1 }
 0xa24   :  { %v1072_v41 = vmul.f32 -1.442695, %v940_v39  ;;  %v941_v42 = vmul.f32 %v937_v40, %v866_v37 }
 0xa26   :  { %1238 = vpow2.f32 %v1072_v41  ;;  %v1073_v43 = vmul.f32 -1.442695, %v941_v42 }
 0xa28   :  { %1240 = vpow2.f32 %v1073_v43 }
 0xa33   :  { %v1239_v45 = vpop.eup %1238 }
 0xa34   :  { %v948_v47 = vadd.f32 1.0, %v1239_v45 }
 0xa35   :  { %v1241_v48 = vpop.eup %1240 }
 0xa36   :  { %1242 = vrcp.f32 %v948_v47  ;;  %v949_v50 = vadd.f32 1.0, %v1241_v48 }
 0xa38   :  { %1244 = vrcp.f32 %v949_v50 }
 0xa43   :  { %v1243_v51 = vpop.eup %1242 }
 0xa44   :  { %v957_v52 = vsub.f32 1.0, %v1243_v51  ;;  %v955_v49 = vadd.f32 0.01, %v1243_v51 }
 0xa45   :  { %v1245_v53 = vpop.eup %1244 }
 0xa46   :  { %v959_v54 = vadd.f32 0.01, %v957_v52  ;;  %v958_v55 = vsub.f32 1.0, %v1245_v53  ;;  %v956_v58 = vadd.f32 0.01, %v1245_v53 }
 0xa48   :  { %1246 = vrcp.f32 %v959_v54  ;;  %v960_v56 = vadd.f32 0.01, %v958_v55 }
 0xa4a   :  { %1248 = vrcp.f32 %v960_v56 }
 0xa55   :  { %v1247_v44 = vpop.eup %1246 }
 0xa56   :  { %v962_v57 = vmul.f32 %v1247_v44, %v955_v49 }
 0xa57   :  { %v1249_v46 = vpop.eup %1248 }
 0xa58   :  { %1250 = vlog2.f32 %v962_v57  ;;  %v964_v59 = vmul.f32 %v1249_v46, %v956_v58 }
 0xa5a   :  { %1252 = vlog2.f32 %v964_v59 }
 0xa65   :  { %v1251_v61 = vpop.eup %1250 }
 0xa66   :  { %v966_v62 = vmul.f32 0.6931472, %v1251_v61 }
 0xa67   :  { %v1253_v0 = vpop.eup %1252 }
 0xa68   :  { %v980_v1 = vadd.f32 %v1074_v60, %v966_v62  ;;  %v968_v2 = vmul.f32 0.6931472, %v1253_v0 }
 0xa6a   :  { %v1075_v3 = vmul.f32 -2.0, %v980_v1  ;;  %v981_v4 = vadd.f32 %v977_v63, %v968_v2 }
 0xa6c   :  { %v986_v5 = vmul.f32 1.442695, %v1075_v3  ;;  %v1076_v6 = vmul.f32 -2.0, %v981_v4 }
 0xa6e   :  { %1254 = vpow2.f32 %v986_v5  ;;  %v988_v9 = vmul.f32 1.442695, %v1076_v6 }
 0xa70   :  { %1256 = vpow2.f32 %v988_v9 }
 0xa7b   :  { %v1255_v10 = vpop.eup %1254 }
 0xa7c   :  { %v990_v11 = vadd.f32 1.0, %v1255_v10 }
 0xa7d   :  { %v1257_v12 = vpop.eup %1256 }
 0xa7e   :  { %v991_v13 = vadd.f32 1.0, %v1257_v12  ;;  %1258 = vrcp.f32 %v990_v11 }
 0xa80   :  { %1260 = vrcp.f32 %v991_v13 }
 0xa8b   :  { %v1259_v8 = vpop.eup %1258 }
 0xa8c   :  { %v997_v18 = vsel %vm996_vm6, %v1259_v8, 0.0 }
 0xa8d   :  { %v1261_v14 = vpop.eup %1260  ;;  %v998_v15 = vrot.slane %v997_v18, 4 }
 0xa8e   :  { %v1004_v16 = vsel %vm996_vm6, %v1261_v14, 0.0 }
 0xa8f   :  { %v999_v7 = vadd.f32 %v998_v15, %v997_v18  ;;  %v1005_v17 = vrot.slane %v1004_v16, 4 }
 0xa91   :  { %v1000_v19 = vrot.slane %v999_v7, 2  ;;  %v1006_v20 = vadd.f32 %v1005_v17, %v1004_v16 }
 0xa93   :  { %v1001_v21 = vadd.f32 %v1000_v19, %v999_v7  ;;  %v1007_v22 = vrot.slane %v1006_v20, 2 }
 0xa95   :  { %v1002_v26 = vrot.slane %v1001_v21, 1  ;;  %v1008_v27 = vadd.f32 %v1007_v22, %v1006_v20 }
 0xa97   :  { %v1003_v28 = vadd.f32 %v1002_v26, %v1001_v21  ;;  %v1009_v29 = vrot.slane %v1008_v27, 1 }
 0xa99   :  { %v1010_v32 = vadd.f32 %v1009_v29, %v1008_v27  ;;  %v1012_v33 = vmul.f32 0.5, %v1003_v28 }
 0xa9b   :  { %v1013_v34 = vmul.f32 0.5, %v1010_v32 }
 0xa9d   :  { %v1016_v36 = vcombine.low %v1012_v33, %v1013_v34 }
 0xa9f   :  { %v1023_v37 = vrot.slane %v1016_v36, %v1022_v35 }
 0xaa1   :  { %v1030_v38 = vrot.slane %v1023_v37, %v1022_v35 }
 0xaa3   :  { %1036 = vst.msk [vmem:[#allocation2] sm:$0x3] %vm1034_vm7, %v1030_v38 }
 0xaa4   :  { %1273 = shalt.err (!%p1270_p4)
}
 0xaa5   :  { %1046 = dma.vmem_to_hbm [thread:$0]  %s1044_s4, 32, %s1586_s9, [#allocation3]  }
 0xaa6   :  { %1282 = dma.done.wait [#allocation3], 32  }
 0xaa7   :  { %1283 = vsyncadd [#allocation3], 4294967264 }
 0xaa8   :  { %1050 = vsyncpa [#allocation3], 1 }

</bundles_post_ra>
